<compile_context>
chip_gen: v7x
topology: tpu7x:2x2x1
jax: 0.10.0
libtpu: 0.0.40
codegen_flags: <defaults>
</compile_context>

<pallas_src>
import functools

import jax
import jax.numpy as jnp
from jax.experimental import pallas as pl
from jax.experimental.pallas import tpu as pltpu


# ----------------------------------------------------------------------------
# helpers
# ----------------------------------------------------------------------------
def _round_up(x, m):
    return (x + m - 1) // m * m


@functools.lru_cache(maxsize=1)
def _vmem_budget():
    """(per-GEMM tile budget, vmem_limit_bytes) chosen per TPU generation."""
    try:
        cap = pltpu.get_tpu_info().vmem_capacity_bytes
    except Exception:           # conservative fallback if the query fails
        cap = 64 << 20
    if cap >= (100 << 20):      # v5e / v6e class: 128 MiB VMEM per core
        return 48 << 20, 96 << 20
    return 24 << 20, 48 << 20   # v7x class: 64 MiB VMEM per TensorCore


def _apply_act(y, act):
    if act == "relu":
        return jnp.maximum(y, 0.0)
    if act == "lrelu":
        return jnp.where(y >= 0.0, y, 0.2 * y)
    if act == "tanh":
        return jnp.tanh(y)
    return y


# ----------------------------------------------------------------------------
# Fused GEMM kernel
#   out = out_act( a_act(A) @ W * scale + shift )        (bf16 out, f32 acc)
#   optional: per-column sum / sum-of-squares of the pre-out_act epilogue
#   accumulated across the M grid axis (for BatchNorm statistics).
# ----------------------------------------------------------------------------
def _gemm_kernel(a_ref, w_ref, s_ref, b_ref, o_ref, *rest,
                 a_act, out_act, want_stats):
    if want_stats:
        sum_ref, sq_ref, acc_ref = rest
    else:
        (acc_ref,) = rest
    i = pl.program_id(1)
    k = pl.program_id(2)

    @pl.when(k == 0)
    def _():
        acc_ref[...] = jnp.zeros_like(acc_ref)

    if want_stats:
        @pl.when((i == 0) & (k == 0))
        def _():
            sum_ref[...] = jnp.zeros_like(sum_ref)
            sq_ref[...] = jnp.zeros_like(sq_ref)

    # Input-side activation fused here (VPU, hidden under the MXU).
    a = _apply_act(a_ref[...], a_act)
    acc_ref[...] += jnp.dot(a, w_ref[...], preferred_element_type=jnp.float32)

    @pl.when(k == pl.num_programs(2) - 1)
    def _():
        y = acc_ref[...] * s_ref[...] + b_ref[...]
        if want_stats:
            # BN statistics in f32 straight from the accumulator (no HBM pass).
            sum_ref[...] += jnp.sum(y, axis=0, keepdims=True)
            sq_ref[...] += jnp.sum(y * y, axis=0, keepdims=True)
        o_ref[...] = _apply_act(y, out_act).astype(o_ref.dtype)


def _pick_tiles(M, K, N, want_stats):
    budget, vmem_limit = _vmem_budget()
    Np = _round_up(N, 128)
    Kp = _round_up(K, 128)
    # Full-N tile: A is read from HBM exactly once; also required so the fused
    # BN statistics blocks are revisited consecutively across the grid.
    tn = Np if want_stats else min(512, Np)
    tm = min(512, _round_up(M, 8))

    def footprint(tm_, tk_):
        return (2 * tm_ * tk_ * 2 + 2 * tk_ * tn * 2 +        # A, W  (bf16, x2)
                2 * tm_ * tn * 2 + tm_ * tn * 4 + 8 * tn * 4)  # out, acc, stats

    cands = [min(c, Kp) for c in (2048, 1024, 512, 256, 128)]
    if Kp <= 2048:
        cands.append(Kp)            # single K step / no extra K padding
    cands = sorted(set(cands), reverse=True)
    tk = cands[-1]
    for c in cands:
        if footprint(tm, c) <= budget:
            tk = c
            break
    while footprint(tm, tk) > budget and tm > 8:
        tm = max(8, _round_up(tm // 2, 8))
    return tm, tn, tk, vmem_limit


def gemm_fused(a, w, scale, shift, *, act="none", a_act="none",
               want_stats=False):
    """bf16 out = act( a_act(a) @ w * scale + shift ); f32 MXU accumulation.

    want_stats=True additionally returns per-column (sum, sum_sq) of the
    pre-`act` epilogue, accumulated inside the GEMM (shift must be zero in
    that case so zero-padded rows do not bias the statistics)."""
    M, K = a.shape
    _, N = w.shape
    tm, tn, tk, vmem_limit = _pick_tiles(M, K, N, want_stats)
    Mp, Kp, Np = _round_up(M, tm), _round_up(K, tk), _round_up(N, tn)

    a_p = a.astype(jnp.bfloat16)
    if (Mp, Kp) != (M, K):                       # skip pad copy when aligned
        a_p = jnp.pad(a_p, ((0, Mp - M), (0, Kp - K)))
    w_p = w.astype(jnp.bfloat16)
    if (Kp, Np) != (K, N):
        w_p = jnp.pad(w_p, ((0, Kp - K), (0, Np - N)))
    s_p = jnp.pad(scale.astype(jnp.float32), (0, Np - N)).reshape(1, Np)
    b_p = jnp.pad(shift.astype(jnp.float32), (0, Np - N)).reshape(1, Np)

    out_shapes = [jax.ShapeDtypeStruct((Mp, Np), jnp.bfloat16)]
    out_specs = [pl.BlockSpec((tm, tn), lambda j, i, k: (i, j))]
    if want_stats:
        out_shapes.append(jax.ShapeDtypeStruct((1, Np), jnp.float32))
        out_shapes.append(jax.ShapeDtypeStruct((1, Np), jnp.float32))
        out_specs.append(pl.BlockSpec((1, tn), lambda j, i, k: (0, j)))
        out_specs.append(pl.BlockSpec((1, tn), lambda j, i, k: (0, j)))
        # M axis must stay sequential for the stats accumulation.
        dims = ("parallel", "arbitrary", "arbitrary")
    else:
        dims = ("parallel", "parallel", "arbitrary")

    res = pl.pallas_call(
        functools.partial(_gemm_kernel, a_act=a_act, out_act=act,
                          want_stats=want_stats),
        out_shape=tuple(out_shapes),
        grid=(Np // tn, Mp // tm, Kp // tk),      # (N, M, K): K innermost
        in_specs=[
            pl.BlockSpec((tm, tk), lambda j, i, k: (i, k)),
            pl.BlockSpec((tk, tn), lambda j, i, k: (k, j)),
            pl.BlockSpec((1, tn), lambda j, i, k: (0, j)),
            pl.BlockSpec((1, tn), lambda j, i, k: (0, j)),
        ],
        out_specs=tuple(out_specs),
        scratch_shapes=[pltpu.VMEM((tm, tn), jnp.float32)],
        compiler_params=pltpu.CompilerParams(
            dimension_semantics=dims, vmem_limit_bytes=vmem_limit),
    )(a_p, w_p, s_p, b_p)

    if want_stats:
        o, ssum, ssq = res
        return o[:M, :N], (ssum[0, :N], ssq[0, :N])
    (o,) = res
    return o[:M, :N], None


# ----------------------------------------------------------------------------
# BatchNorm apply: lane-dense (N*H, W*C) Pallas affine kernel, wide row tiles.
# ----------------------------------------------------------------------------
def _affine_kernel(x_ref, s_ref, b_ref, o_ref):
    y = x_ref[...].astype(jnp.float32) * s_ref[...] + b_ref[...]
    o_ref[...] = y.astype(o_ref.dtype)


def _row_tile(M, L, bytes_per_elt):
    budget, _ = _vmem_budget()
    target = min(8 << 20, budget // 4)           # multi-MiB blocks, no 512 cap
    rows = max(8, (target // max(L * bytes_per_elt, 1)) // 8 * 8)
    return min(rows, _round_up(M, 8))


def affine_nhwc(x, scale, shift):
    """Per-channel y = x*scale + shift on an NHWC tensor (lane-dense view)."""
    N, H, W, C = x.shape
    x2d = x.reshape(N * H, W * C)
    M, L = x2d.shape
    s_row = jnp.tile(scale.astype(jnp.float32), W).reshape(1, L)
    b_row = jnp.tile(shift.astype(jnp.float32), W).reshape(1, L)
    tm = _row_tile(M, L, x.dtype.itemsize)
    Mp = _round_up(M, tm)
    x_p = x2d if Mp == M else jnp.pad(x2d, ((0, Mp - M), (0, 0)))
    _, vmem_limit = _vmem_budget()
    y = pl.pallas_call(
        _affine_kernel,
        out_shape=jax.ShapeDtypeStruct((Mp, L), x.dtype),
        grid=(Mp // tm,),
        in_specs=[pl.BlockSpec((tm, L), lambda i: (i, 0)),
                  pl.BlockSpec((1, L), lambda i: (0, 0)),
                  pl.BlockSpec((1, L), lambda i: (0, 0))],
        out_specs=pl.BlockSpec((tm, L), lambda i: (i, 0)),
        compiler_params=pltpu.CompilerParams(
            dimension_semantics=("parallel",), vmem_limit_bytes=vmem_limit),
    )(x_p, s_row, b_row)
    return y[:M].reshape(N, H, W, C)


def batchnorm_apply(x, stats, gamma, beta, eps=1e-5):
    """BatchNorm2d (train mode, biased variance) from GEMM-fused statistics."""
    N, H, W, _ = x.shape
    count = N * H * W
    ssum, ssq = stats
    mean = ssum / count
    var = jnp.maximum(ssq / count - mean * mean, 0.0)   # clamp tiny negatives
    scale = gamma / jnp.sqrt(var + eps)
    shift = beta - mean * scale
    return affine_nhwc(x, scale, shift)


# ----------------------------------------------------------------------------
# Convolutions (im2col / phase glue in JAX, GEMMs in Pallas)
# ----------------------------------------------------------------------------
# TODO(synk): the im2col patch tensor is still materialized in HBM by XLA;
# folding the patch gather into the GEMM's input DMA (memory_space=pl.ANY +
# strided make_async_copy double-buffering) would remove that blow-up and is
# the largest remaining win, especially on v5e.
def _im2col(x_nhwc, k, stride, pad):
    N, H, W, C = x_nhwc.shape
    xp = jnp.pad(x_nhwc, ((0, 0), (pad, pad), (pad, pad), (0, 0)))
    OH = (H + 2 * pad - k) // stride + 1
    OW = (W + 2 * pad - k) // stride + 1
    patches = []
    for kh in range(k):
        for kw in range(k):
            patches.append(
                xp[:, kh:kh + stride * (OH - 1) + 1:stride,
                      kw:kw + stride * (OW - 1) + 1:stride, :])
    p = jnp.stack(patches, axis=3)                       # (N, OH, OW, k*k, C)
    return p.reshape(N * OH * OW, k * k * C), (N, OH, OW)


def conv_down(x, w_pt, *, act="none", a_act="none", want_stats=False):
    """Conv2d(k=4, s=2, p=1, bias=False).  `a_act` (the preceding Leaky/ReLU)
    is applied to the A tiles inside the GEMM; `act` is fused in the epilogue;
    BN statistics optionally accumulated in the epilogue."""
    Cout, Cin, k, _ = w_pt.shape
    patches, (N, OH, OW) = _im2col(x.astype(jnp.bfloat16), k, 2, 1)
    w2d = jnp.transpose(w_pt, (2, 3, 1, 0)).reshape(k * k * Cin, Cout)
    ones = jnp.ones((Cout,), jnp.float32)
    zeros = jnp.zeros((Cout,), jnp.float32)
    y, stats = gemm_fused(patches, w2d, ones, zeros,
                          act=act, a_act=a_act, want_stats=want_stats)
    return y.reshape(N, OH, OW, Cout), stats


def _phase_taps(phase):
    # kernel tap used by output phase `phase` for each 3x3-neighbourhood
    # offset index d in {0:-1, 1:0, 2:+1}; offsets not listed contribute zero.
    return {0: 3, 1: 1} if phase == 0 else {1: 2, 2: 0}


def conv_up(x, w_pt, bias, *, act="none", a_act="none", want_stats=False):
    """ConvTranspose2d(k=4, s=2, p=1) as a single fused GEMM.

    A 3x3 stride-1 im2col of the input (K = 9*Cin) covers the taps needed by
    all four output phases; each phase's 2x2 effective kernel is embedded in
    that K with zeros at unused taps and the four phase weights are
    concatenated along N (-> 4*Cout columns).  The output is then interleaved
    to (N, 2H, 2W, Cout) with a reshape/transpose."""
    Cin, Cout, _, _ = w_pt.shape
    N, H, W, _ = x.shape
    patches, _ = _im2col(x.astype(jnp.bfloat16), 3, 1, 1)   # (N*H*W, 9*Cin)

    w_cols = []
    for py, px in ((0, 0), (0, 1), (1, 0), (1, 1)):
        rt, ct = _phase_taps(py), _phase_taps(px)
        taps = []
        for dy in range(3):
            for dx in range(3):
                if dy in rt and dx in ct:
                    taps.append(w_pt[:, :, rt[dy], ct[dx]])
                else:
                    taps.append(jnp.zeros((Cin, Cout), w_pt.dtype))
        w_cols.append(jnp.stack(taps, axis=0).reshape(9 * Cin, Cout))
    w_big = jnp.concatenate(w_cols, axis=1)                  # (9*Cin, 4*Cout)

    ones = jnp.ones((4 * Cout,), jnp.float32)
    shift = jnp.tile(bias.astype(jnp.float32), 4)            # zero when BN'd
    y, stats = gemm_fused(patches, w_big, ones, shift,
                          act=act, a_act=a_act, want_stats=want_stats)
    y = y.reshape(N, H, W, 2, 2, Cout)
    y = jnp.transpose(y, (0, 1, 3, 2, 4, 5)).reshape(N, 2 * H, 2 * W, Cout)
    if want_stats:
        ssum, ssq = stats
        stats = (ssum.reshape(4, Cout).sum(0), ssq.reshape(4, Cout).sum(0))
    return y, stats


# ----------------------------------------------------------------------------
# UnetGenerator parameters + forward
# ----------------------------------------------------------------------------
def init_params(key, input_nc, output_nc, ngf, num_downs):
    # specs ordered innermost -> outermost (matches UnetGenerator.__init__)
    specs = [dict(kind="innermost", outer=ngf * 8, inner=ngf * 8, inp=ngf * 8)]
    for _ in range(num_downs - 5):
        specs.append(dict(kind="mid", outer=ngf * 8, inner=ngf * 8, inp=ngf * 8))
    specs.append(dict(kind="mid", outer=ngf * 4, inner=ngf * 8, inp=ngf * 4))
    specs.append(dict(kind="mid", outer=ngf * 2, inner=ngf * 4, inp=ngf * 2))
    specs.append(dict(kind="mid", outer=ngf, inner=ngf * 2, inp=ngf))
    specs.append(dict(kind="outermost", outer=output_nc, inner=ngf, inp=input_nc))

    params = []
    for spec in specs:
        key, k0, k1, k2 = jax.random.split(key, 4)
        inner, outer, inp = spec["inner"], spec["outer"], spec["inp"]
        p = {"kind": spec["kind"]}
        # downconv: Conv2d(inp, inner, 4, 2, 1, bias=False)  [BatchNorm => no bias]
        p["down_w"] = 0.05 * jax.random.normal(k0, (inner, inp, 4, 4), jnp.float32)
        up_in = inner if spec["kind"] == "innermost" else inner * 2
        # upconv: ConvTranspose2d(up_in, outer, 4, 2, 1); bias only on outermost
        p["up_w"] = 0.05 * jax.random.normal(k1, (up_in, outer, 4, 4), jnp.float32)
        if spec["kind"] == "outermost":
            p["up_b"] = 0.05 * jax.random.normal(k2, (outer,), jnp.float32)
        else:
            p["up_b"] = jnp.zeros((outer,), jnp.float32)
        if spec["kind"] == "mid":
            p["dn_gamma"] = jnp.ones((inner,), jnp.float32)
            p["dn_beta"] = jnp.zeros((inner,), jnp.float32)
        if spec["kind"] != "outermost":
            p["un_gamma"] = jnp.ones((outer,), jnp.float32)
            p["un_beta"] = jnp.zeros((outer,), jnp.float32)
        params.append(p)
    return params


def unet_forward(x_nchw, params):
    x = jnp.transpose(x_nchw, (0, 2, 3, 1)).astype(jnp.bfloat16)  # NCHW -> NHWC bf16

    def run(idx, xin):
        p = params[idx]
        kind = p["kind"]
        if kind == "outermost":
            h, _ = conv_down(xin, p["down_w"])                     # down = [downconv]
            h = run(idx - 1, h)                                    # submodule
            # uprelu fused into the A operand, Tanh fused into the epilogue
            h, _ = conv_up(h, p["up_w"], p["up_b"], act="tanh", a_act="relu")
            return h                                               # no skip
        if kind == "mid":
            # LeakyReLU(0.2) fused into the downconv GEMM; BN stats fused too
            h, st = conv_down(xin, p["down_w"], a_act="lrelu", want_stats=True)
            h = batchnorm_apply(h, st, p["dn_gamma"], p["dn_beta"])   # downnorm
            h = run(idx - 1, h)                                       # submodule
            # uprelu fused into the upconv GEMM; BN stats fused too
            h, st = conv_up(h, p["up_w"], p["up_b"], a_act="relu", want_stats=True)
            h = batchnorm_apply(h, st, p["un_gamma"], p["un_beta"])   # upnorm
            return jnp.concatenate([xin, h], axis=-1)                 # skip
        # innermost: downrelu fused into A, uprelu fused into the epilogue
        h, _ = conv_down(xin, p["down_w"], act="relu", a_act="lrelu")
        h, st = conv_up(h, p["up_w"], p["up_b"], want_stats=True)     # upconv
        h = batchnorm_apply(h, st, p["un_gamma"], p["un_beta"])       # upnorm
        return jnp.concatenate([xin, h], axis=-1)

    y = run(len(params) - 1, x)
    return jnp.transpose(y, (0, 3, 1, 2)).astype(jnp.float32)  # NHWC -> NCHW


# ----------------------------------------------------------------------------
if __name__ == "__main__":
    key = jax.random.PRNGKey(0)

    # --- numerical check of the conv primitives against lax references ------
    kc, key = jax.random.split(key)
    k1, k2, k3, k4, k5 = jax.random.split(kc, 5)

    xd = jax.random.normal(k1, (1, 6, 6, 3), jnp.float32)
    wd = 0.05 * jax.random.normal(k2, (5, 3, 4, 4), jnp.float32)   # (Cout,Cin,4,4)
    got_d, _ = conv_down(xd, wd)
    ref_d = jax.lax.conv_general_dilated(
        xd, jnp.transpose(wd, (2, 3, 1, 0)), window_strides=(2, 2),
        padding=((1, 1), (1, 1)), dimension_numbers=("NHWC", "HWIO", "NHWC"))
    assert float(jnp.max(jnp.abs(got_d.astype(jnp.float32) - ref_d))) < 5e-2

    xu = jax.random.normal(k3, (1, 5, 5, 6), jnp.float32)
    wu = 0.05 * jax.random.normal(k4, (6, 5, 4, 4), jnp.float32)   # (Cin,Cout,4,4)
    bu = 0.05 * jax.random.normal(k5, (5,), jnp.float32)
    got_u, _ = conv_up(xu, wu, bu)
    w_flip = jnp.transpose(jnp.flip(wu, axis=(2, 3)), (2, 3, 0, 1))  # HWIO
    ref_u = jax.lax.conv_general_dilated(
        xu, w_flip, window_strides=(1, 1), padding=((2, 2), (2, 2)),
        lhs_dilation=(2, 2), dimension_numbers=("NHWC", "HWIO", "NHWC")) + bu
    assert float(jnp.max(jnp.abs(got_u.astype(jnp.float32) - ref_u))) < 5e-2

    # --- end-to-end forward ---------------------------------------------------
    kp, kx = jax.random.split(key)
    # num_downs=5 => the U-Net has 5 down levels, so spatial must be >= 32.
    input_nc, output_nc, ngf, num_downs = 4, 4, 8, 5
    params = init_params(kp, input_nc, output_nc, ngf, num_downs)
    x = jax.random.normal(kx, (2, input_nc, 32, 32), jnp.float32)  # NCHW

    fwd = jax.jit(lambda inp: unet_forward(inp, params))
    y = fwd(x)
    jax.block_until_ready(y)

    assert y.shape == (2, output_nc, 32, 32), y.shape
    assert bool(jnp.all(jnp.isfinite(y)))
    print("KERNEL_OK")
</pallas_src>

<mosaic_0001>
module attributes {stable_mosaic.version = 11 : i64} {
  func.func @_gemm_kernel(%arg0: i32, %arg1: i32, %arg2: i32, %arg3: memref<16x128xbf16, #tpu.memory_space<vmem>>, %arg4: memref<128x128xbf16, #tpu.memory_space<vmem>>, %arg5: memref<1x128xf32, #tpu.memory_space<vmem>>, %arg6: memref<1x128xf32, #tpu.memory_space<vmem>>, %arg7: memref<16x128xbf16, #tpu.memory_space<vmem>>, %arg8: memref<16x128xf32, #tpu.memory_space<vmem>>) attributes {dimension_semantics = [#tpu.dimension_semantics<parallel>, #tpu.dimension_semantics<parallel>, #tpu.dimension_semantics<arbitrary>], iteration_bounds = array<i64: 1, 1, 1>, scalar_prefetch = 0 : i64, scratch_operands = 1 : i64, tpu.core_type = #tpu.core_type<tc>, window_params = [{transform_indices = @transform_0, window_bounds = array<i64: 16, 128>}, {transform_indices = @transform_1, window_bounds = array<i64: 128, 128>}, {transform_indices = @transform_2, window_bounds = array<i64: 1, 128>}, {transform_indices = @transform_3, window_bounds = array<i64: 1, 128>}, {transform_indices = @transform_4, window_bounds = array<i64: 16, 128>}]} {
    %c0_i32 = arith.constant 0 : i32
    %0 = arith.cmpi eq, %arg2, %c0_i32 : i32
    %1 = arith.extui %0 : i1 to i32
    %c0_i32_0 = arith.constant 0 : i32
    %2 = arith.cmpi ne, %1, %c0_i32_0 : i32
    scf.if %2 {
      %cst_10 = arith.constant 0.000000e+00 : f32
      %12 = vector.broadcast %cst_10 : f32 to vector<16x128xf32>
      %c0_11 = arith.constant 0 : index
      %c0_12 = arith.constant 0 : index
      %13 = vector.load %arg8[%c0_11, %c0_12] : memref<16x128xf32, #tpu.memory_space<vmem>>, vector<16x128xf32>
      tpu.vector_store %arg8[%c0_11, %c0_12], %12 {strides = array<i32>} : memref<16x128xf32, #tpu.memory_space<vmem>>, vector<16x128xf32>,
    } else {
    }
    %c0 = arith.constant 0 : index
    %c0_1 = arith.constant 0 : index
    %3 = vector.load %arg3[%c0, %c0_1] : memref<16x128xbf16, #tpu.memory_space<vmem>>, vector<16x128xbf16>
    %c0_2 = arith.constant 0 : index
    %c0_3 = arith.constant 0 : index
    %4 = vector.load %arg8[%c0_2, %c0_3] : memref<16x128xf32, #tpu.memory_space<vmem>>, vector<16x128xf32>
    %c0_4 = arith.constant 0 : index
    %c0_5 = arith.constant 0 : index
    %5 = vector.load %arg4[%c0_4, %c0_5] : memref<128x128xbf16, #tpu.memory_space<vmem>>, vector<128x128xbf16>
    %cst = arith.constant dense<0.000000e+00> : vector<16x128xf32>
    %6 = tpu.matmul %3, %5, %cst {dimension_numbers = #tpu.dot_dimension_numbers<[1], [0], [0], [1], [0, 0, 1, 1], [], []>} : vector<16x128xbf16>, vector<128x128xbf16>, vector<16x128xf32> -> vector<16x128xf32>
    %7 = arith.addf %4, %6 : vector<16x128xf32>
    %c0_6 = arith.constant 0 : index
    %c0_7 = arith.constant 0 : index
    %8 = vector.load %arg8[%c0_6, %c0_7] : memref<16x128xf32, #tpu.memory_space<vmem>>, vector<16x128xf32>
    tpu.vector_store %arg8[%c0_6, %c0_7], %7 {strides = array<i32>} : memref<16x128xf32, #tpu.memory_space<vmem>>, vector<16x128xf32>,
    %c0_i32_8 = arith.constant 0 : i32
    %9 = arith.cmpi eq, %arg2, %c0_i32_8 : i32
    %10 = arith.extui %9 : i1 to i32
    %c0_i32_9 = arith.constant 0 : i32
    %11 = arith.cmpi ne, %10, %c0_i32_9 : i32
    scf.if %11 {
      %c0_10 = arith.constant 0 : index
      %c0_11 = arith.constant 0 : index
      %12 = vector.load %arg8[%c0_10, %c0_11] : memref<16x128xf32, #tpu.memory_space<vmem>>, vector<16x128xf32>
      %c0_12 = arith.constant 0 : index
      %c0_13 = arith.constant 0 : index
      %13 = vector.load %arg5[%c0_12, %c0_13] : memref<1x128xf32, #tpu.memory_space<vmem>>, vector<1x128xf32>
      %14 = vector.broadcast %13 : vector<1x128xf32> to vector<16x128xf32>
      %15 = arith.mulf %12, %14 : vector<16x128xf32>
      %c0_14 = arith.constant 0 : index
      %c0_15 = arith.constant 0 : index
      %16 = vector.load %arg6[%c0_14, %c0_15] : memref<1x128xf32, #tpu.memory_space<vmem>>, vector<1x128xf32>
      %17 = vector.broadcast %16 : vector<1x128xf32> to vector<16x128xf32>
      %18 = arith.addf %15, %17 : vector<16x128xf32>
      %19 = arith.truncf %18 : vector<16x128xf32> to vector<16x128xbf16>
      %c0_16 = arith.constant 0 : index
      %c0_17 = arith.constant 0 : index
      %20 = vector.load %arg7[%c0_16, %c0_17] : memref<16x128xbf16, #tpu.memory_space<vmem>>, vector<16x128xbf16>
      tpu.vector_store %arg7[%c0_16, %c0_17], %19 {strides = array<i32>} : memref<16x128xbf16, #tpu.memory_space<vmem>>, vector<16x128xbf16>,
    } else {
    }
    return
  }
  func.func @transform_0(%arg0: i32, %arg1: i32, %arg2: i32) -> (i32, i32) {
    %c0_i32 = arith.constant 0 : i32
    return %arg1, %arg2 : i32, i32
  }
  func.func @transform_1(%arg0: i32, %arg1: i32, %arg2: i32) -> (i32, i32) {
    %c0_i32 = arith.constant 0 : i32
    return %arg2, %arg0 : i32, i32
  }
  func.func @transform_2(%arg0: i32, %arg1: i32, %arg2: i32) -> (i32, i32) {
    %c0_i32 = arith.constant 0 : i32
    %c0_i32_0 = arith.constant 0 : i32
    return %c0_i32, %arg0 : i32, i32
  }
  func.func @transform_3(%arg0: i32, %arg1: i32, %arg2: i32) -> (i32, i32) {
    %c0_i32 = arith.constant 0 : i32
    %c0_i32_0 = arith.constant 0 : i32
    return %c0_i32, %arg0 : i32, i32
  }
  func.func @transform_4(%arg0: i32, %arg1: i32, %arg2: i32) -> (i32, i32) {
    %c0_i32 = arith.constant 0 : i32
    return %arg1, %arg0 : i32, i32
  }
}

</mosaic_0001>

<bundles_post_ra>
// kernel: tpu_custom_call.1
= control target key start
LH: loop header
LB: loop body
LE: loop exit
PB: predicated region body
PF: predicated region fallthrough
CT: control target
= control target key end

     0   :  { %9 = vsyncpa [#allocation4], 0  ;;  %s443_s0 = inlined_call_operand.hbm [shape: bf16[16,128], index: 0, kind: input, shape index: {}]   ;;  %s444_s1 = inlined_call_operand.hbm [shape: bf16[128,128], index: 1, kind: input, shape index: {}]   ;;  %s445_s2 = inlined_call_operand.vmem [shape: f32[1,128], index: 2, kind: input, shape index: {}]   ;;  %s446_s3 = inlined_call_operand.vmem [shape: f32[1,128], index: 3, kind: input, shape index: {}]   ;;  %s447_s4 = inlined_call_operand.hbm [shape: bf16[16,128], index: 4, kind: output, shape index: {}]  }
   0x1   :  { %10 = vsyncpa [#allocation7], 0 }
   0x2   :  { %11 = vsyncpa [#allocation5], 0  ;;  %s360_s15 = smov [#allocation3]   ;;  %s288_s19 = scalar_lea.hbm %s443_s0, 128 }
   0x3   :  { %s17_s16 = sshll.u32 %s360_s15, 4  ;;  %p289_p0 = scmp.ne.s32.totalorder %s443_s0, %s288_s19  ;;  %s18_s16 = int_to_ptr.vmem [resolvable:$true] %s17_s16 }
   0x4   :  { %p292_p1 = scmp.lt.u32.totalorder %s288_s19, %s443_s0 }
   0x6   :  { %p294_p2 = pnand %p292_p1, %p289_p0 }
   0x8   :  { %297 = shalt.err (!%p294_p2)
}
   0x9   :  { %s298_s24 = scalar_lea.vmem %s18_s16, 128  ;;  %p303_p4 = scmp.lt.s32.totalorder %s18_s16, %s18_s16 }
   0xa   :  { %p299_p3 = scmp.ne.s32.totalorder %s18_s16, %s298_s24  ;;  %p304_p5 = scmp.lt.s32.totalorder %s298_s24, %s298_s24 }
   0xc   :  { %p305_p6 = por %p304_p5, %p303_p4 }
   0xe   :  { %p306_p7 = pnand %p305_p6, %p299_p3 }
  0x10   :  { %309 = shalt.err (!%p306_p7)
}
  0x11   :  { %s361_s25 = smov 64   ;;  %s362_s26 = smov 4  }
  0x12   :  { %23 = dma.hbm_to_vmem [thread:$0]  %s443_s0, 128, %s18_s16, [#allocation4], %s361_s25, %s361_s25, %s362_s26  }
  0x13   :  { %s363_s29 = smov [#allocation6]   ;;  %s310_s7 = scalar_lea.hbm %s444_s1, 1024 }
  0x14   :  { %s29_s30 = sshll.u32 %s363_s29, 4  ;;  %p311_p8 = scmp.ne.s32.totalorder %s444_s1, %s310_s7  ;;  %s30_s30 = int_to_ptr.vmem [resolvable:$true] %s29_s30 }
  0x15   :  { %p314_p9 = scmp.lt.u32.totalorder %s310_s7, %s444_s1 }
  0x17   :  { %p316_p10 = pnand %p314_p9, %p311_p8 }
  0x19   :  { %319 = shalt.err (!%p316_p10)
}
  0x1a   :  { %s320_s12 = scalar_lea.vmem %s30_s30, 1024  ;;  %p325_p12 = scmp.lt.s32.totalorder %s30_s30, %s30_s30 }
  0x1b   :  { %p321_p11 = scmp.ne.s32.totalorder %s30_s30, %s320_s12  ;;  %p326_p13 = scmp.lt.s32.totalorder %s320_s12, %s320_s12 }
  0x1d   :  { %p327_p0 = por %p326_p13, %p325_p12 }
  0x1f   :  { %p328_p1 = pnand %p327_p0, %p321_p11 }
  0x21   :  { %331 = shalt.err (!%p328_p1)
}
  0x22   :  { %35 = dma.hbm_to_vmem [thread:$0]  %s444_s1, 1024, %s30_s30, [#allocation7], %s361_s25, %s361_s25, %s362_s26  }
  0x23   :  { %354 = dma.done.wait [#allocation4], 128  }
  0x24   :  { %355 = vsyncadd [#allocation4], 4294967168 }
  0x25   :  { %356 = dma.done.wait [#allocation7], 1024  }
  0x26   :  { %357 = vsyncadd [#allocation7], 4294966272  ;;  %v364_v0 = vmov 0.0   ;;  %vm365_vm0 = vmmov 0   ;;  %v279_v1 = vld [vmem:[#allocation6] sm:$0xff]   ;;  %v280_v2 = vld [vmem:[#allocation6 + $0x8] sm:$0xff]  }
  0x27   :  { %252 = vmatprep.subr.bf16.mxu0 %v364_v0  ;;  %268 = vmatprep.mubr.msk.bf16.mxu0 %vm365_vm0, %v364_v0  ;;  %v281_v3 = vld [vmem:[#allocation6 + $0x10] sm:$0xff]   ;;  %v282_v4 = vld [vmem:[#allocation6 + $0x18] sm:$0xff]   ;;  %v283_v5 = vld [vmem:[#allocation6 + $0x20] sm:$0xff]   ;;  %s366_s17 = smov [#allocation8]  }
  0x28   :  { %253 = vmatpush3.bf16.msra.mxu0 %v279_v1  ;;  %v284_v6 = vld [vmem:[#allocation6 + $0x28] sm:$0xff]   ;;  %v285_v7 = vld [vmem:[#allocation6 + $0x30] sm:$0xff]   ;;  %v286_v8 = vld [vmem:[#allocation6 + $0x38] sm:$0xff]   ;;  %s210_s18 = sshll.u32 %s366_s17, 4  ;;  %s211_s18 = int_to_ptr.vmem [resolvable:$true] %s210_s18 }
  0x29   :  { %254 = vmatprep.subr.bf16.mxu0 %v364_v0  ;;  %v287_v9 = vld [vmem:[#allocation3] sm:$0xff]   ;;  %s332_s19 = scalar_lea.vmem %s211_s18, 128  ;;  %p337_p3 = scmp.lt.s32.totalorder %s211_s18, %s211_s18 }
  0x2a   :  { %v232_v10 = vld [vmem:[%s445_s2] ss:$0 sm:$0xff]  ;;  %p333_p2 = scmp.ne.s32.totalorder %s211_s18, %s332_s19  ;;  %p338_p4 = scmp.lt.s32.totalorder %s332_s19, %s332_s19 }
  0x2b   :  { %v233_v14 = vld [vmem:[%s446_s3] ss:$0 sm:$0xff] }
  0x2c   :  { %255 = vmatpush3.bf16.msra.mxu0 %v280_v2  ;;  %p339_p5 = por %p338_p4, %p337_p3 }
  0x2d   :  { %256 = vmatprep.subr.bf16.mxu0 %v364_v0 }
  0x2e   :  { %p340_p6 = pnand %p339_p5, %p333_p2 }
  0x30   :  { %257 = vmatpush3.bf16.msra.mxu0 %v281_v3 }
  0x31   :  { %258 = vmatprep.subr.bf16.mxu0 %v364_v0 }
  0x34   :  { %259 = vmatpush3.bf16.msra.mxu0 %v282_v4 }
  0x35   :  { %260 = vmatprep.subr.bf16.mxu0 %v364_v0 }
  0x38   :  { %261 = vmatpush3.bf16.msra.mxu0 %v283_v5 }
  0x39   :  { %262 = vmatprep.subr.bf16.mxu0 %v364_v0 }
  0x3c   :  { %263 = vmatpush3.bf16.msra.mxu0 %v284_v6 }
  0x3d   :  { %264 = vmatprep.subr.bf16.mxu0 %v364_v0 }
  0x40   :  { %265 = vmatpush3.bf16.msra.mxu0 %v285_v7 }
  0x41   :  { %266 = vmatprep.subr.bf16.mxu0 %v364_v0 }
  0x44   :  { %267 = vmatpush3.bf16.msra.mxu0 %v286_v8 }
  0x47   :  { %269 = vmatmul.mubr.bf16.vlgmr.msra.gmra.mrb[0].mxu0 %v287_v9 }
 0x11a   :  { %v161_v11 = vpop.f32.mrb[0].mxu0 }
 0x11b   :  { %v184_v12 = vmul.f32 %v232_v10, %v161_v11  ;;  %v270_v13 = vpop.f32.mrb[1].mxu0 }
 0x11c   :  { %v164_v15 = vpop.f32.mrb[2].mxu0 }
 0x11d   :  { %v185_v16 = vmul.f32 %v232_v10, %v164_v15  ;;  %v271_v17 = vpop.f32.mrb[3].mxu0  ;;  %v193_v18 = vadd.f32 %v233_v14, %v184_v12 }
 0x11f   :  { %v194_v19 = vadd.f32 %v233_v14, %v185_v16 }
 0x121   :  { %v241_v20 = vpack.c.bf16 %v194_v19, %v193_v18 }
 0x123   :  { %242 = vst [vmem:[#allocation8] sm:$0xff] %v241_v20  }
 0x124   :  { %343 = shalt.err (!%p340_p6)
}
 0x125   :  { %s344_s3 = scalar_lea.hbm %s447_s4, 128 }
 0x126   :  { %p345_p7 = scmp.ne.s32.totalorder %s447_s4, %s344_s3  ;;  %p348_p8 = scmp.lt.u32.totalorder %s344_s3, %s447_s4 }
 0x128   :  { %p350_p9 = pnand %p348_p8, %p345_p7 }
 0x12a   :  { %353 = shalt.err (!%p350_p9)
}
 0x12b   :  { %216 = dma.vmem_to_hbm [thread:$0]  %s211_s18, 128, %s447_s4, [#allocation5], %s361_s25, %s361_s25, %s362_s26  }
 0x12c   :  { %358 = dma.done.wait [#allocation5], 128  }
 0x12d   :  { %359 = vsyncadd [#allocation5], 4294967168 }
 0x12e   :  { %220 = vsyncpa [#allocation4], 1 }
 0x12f   :  { %221 = vsyncpa [#allocation7], 1 }
 0x130   :  { %222 = vsyncpa [#allocation5], 1 }

</bundles_post_ra>
